<compile_context>
chip_gen: v6e
topology: v6e:2x2x1
jax: 0.10.0
libtpu: 0.0.40
codegen_flags: <defaults>
</compile_context>

<pallas_src>
import functools

import jax
import jax.numpy as jnp
from jax.experimental import pallas as pl
from jax.experimental.pallas import tpu as pltpu


def _round_up(x, m):
    return (x + m - 1) // m * m


def _vmem_capacity_bytes():
    try:
        return int(pltpu.get_tpu_info().vmem_capacity_bytes)
    except Exception:
        return 64 * 1024 * 1024  # conservative default (v7x: 64 MiB per core)


# -----------------------------------------------------------------------------
# Fully fused single-pass kernel: conv matmul + batch stats + tiled BN apply.
#
# Grid = (2, nt), phase-major iteration:
#   phase 0, tile i : (Cout,K)@(K,tm) on the MXU, per-channel sum / sum-sq
#                     accumulation, result parked in a resident VMEM slab.
#   phase 1, i == 0 : fold stats into per-channel scale/shift (scratch).
#   phase 1, tile i : normalize slab slice i and store to a per-tile
#                     lane-dense (Cout, tm) output block (pipelined writeback).
# -----------------------------------------------------------------------------
def _fused_conv_bn_kernel(eps, m_true, w_ref, p_ref, g_ref, b_ref, o_ref,
                          acc_ref, sum_ref, sq_ref, scale_ref, shift_ref):
    ph = pl.program_id(0)
    i = pl.program_id(1)
    tm = p_ref.shape[1]
    off = pl.multiple_of(i * tm, 128)

    @pl.when(jnp.logical_and(ph == 0, i == 0))
    def _():
        sum_ref[...] = jnp.zeros_like(sum_ref)
        sq_ref[...] = jnp.zeros_like(sq_ref)

    @pl.when(ph == 0)
    def _():
        # (Cout, K) x (K, tm) -> (Cout, tm), f32 accumulation on the MXU.
        y = jnp.dot(w_ref[...], p_ref[...], preferred_element_type=jnp.float32)
        # Per-channel batch statistics ride in VPU/XLU slots next to the MXU
        # path; zero-padded columns contribute nothing to either sum.
        sum_ref[...] += jnp.sum(y, axis=1, keepdims=True)
        sq_ref[...] += jnp.sum(y * y, axis=1, keepdims=True)
        acc_ref[:, pl.ds(off, tm)] = y           # park in resident VMEM slab

    @pl.when(jnp.logical_and(ph == 1, i == 0))
    def _():
        mean = sum_ref[...] / m_true                                  # (Cout,1)
        var = jnp.maximum(sq_ref[...] / m_true - mean * mean, 0.0)
        scale_ref[...] = g_ref[...] * jax.lax.rsqrt(var + eps)
        shift_ref[...] = b_ref[...] - mean * scale_ref[...]

    @pl.when(ph == 1)
    def _():
        o_ref[...] = (acc_ref[:, pl.ds(off, tm)] * scale_ref[...]
                      + shift_ref[...])


def fused_conv_bn(patches_t, w2d, gamma2d, beta2d, *, m_true, tm, eps,
                  vmem_limit):
    K, Mp = patches_t.shape
    cout = w2d.shape[0]
    nt = Mp // tm
    kernel = functools.partial(_fused_conv_bn_kernel, eps, float(m_true))
    return pl.pallas_call(
        kernel,
        out_shape=jax.ShapeDtypeStruct((cout, Mp), jnp.float32),
        grid_spec=pltpu.PrefetchScalarGridSpec(
            num_scalar_prefetch=0,
            grid=(2, nt),
            in_specs=[
                pl.BlockSpec((cout, K), lambda p, i: (0, 0)),    # weights
                # Patch tiles stream during phase 0 only; phase 1 pins the last
                # block index so no patch tile is re-fetched.
                pl.BlockSpec((K, tm),
                             lambda p, i: (0, (1 - p) * i + p * (nt - 1))),
                pl.BlockSpec((cout, 1), lambda p, i: (0, 0)),    # gamma
                pl.BlockSpec((cout, 1), lambda p, i: (0, 0)),    # beta
            ],
            # Constant block during phase 0 (no garbage writeback); per-tile
            # lane-dense blocks during phase 1 (writeback pipelined).
            out_specs=pl.BlockSpec((cout, tm), lambda p, i: (0, p * i)),
            scratch_shapes=[
                pltpu.VMEM((cout, Mp), jnp.float32),   # resident conv slab
                pltpu.VMEM((cout, 1), jnp.float32),    # sum
                pltpu.VMEM((cout, 1), jnp.float32),    # sum of squares
                pltpu.VMEM((cout, 1), jnp.float32),    # scale
                pltpu.VMEM((cout, 1), jnp.float32),    # shift
            ],
        ),
        compiler_params=pltpu.CompilerParams(
            # Stats accumulate across tiles and phase order matters.
            dimension_semantics=("arbitrary", "arbitrary"),
            vmem_limit_bytes=vmem_limit),
    )(w2d, patches_t, gamma2d, beta2d)


# -----------------------------------------------------------------------------
# Fallback path for very large M: (1) matmul + stats fused, (2) in-place BN.
# -----------------------------------------------------------------------------
def _mm_stats_kernel(w_ref, p_ref, o_ref, sum_ref, sq_ref):
    @pl.when(pl.program_id(0) == 0)
    def _():
        sum_ref[...] = jnp.zeros_like(sum_ref)
        sq_ref[...] = jnp.zeros_like(sq_ref)
    y = jnp.dot(w_ref[...], p_ref[...], preferred_element_type=jnp.float32)
    o_ref[...] = y
    sum_ref[...] += jnp.sum(y, axis=1, keepdims=True)
    sq_ref[...] += jnp.sum(y * y, axis=1, keepdims=True)


def conv_matmul_stats(patches_t, w2d, *, tm, vmem_limit):
    K, Mp = patches_t.shape
    cout = w2d.shape[0]
    return pl.pallas_call(
        _mm_stats_kernel,
        out_shape=(jax.ShapeDtypeStruct((cout, Mp), jnp.float32),
                   jax.ShapeDtypeStruct((cout, 1), jnp.float32),
                   jax.ShapeDtypeStruct((cout, 1), jnp.float32)),
        grid_spec=pltpu.PrefetchScalarGridSpec(
            num_scalar_prefetch=0,
            grid=(Mp // tm,),
            in_specs=[pl.BlockSpec((cout, K), lambda i: (0, 0)),
                      pl.BlockSpec((K, tm), lambda i: (0, i))],
            out_specs=[pl.BlockSpec((cout, tm), lambda i: (0, i)),
                       pl.BlockSpec((cout, 1), lambda i: (0, 0)),
                       pl.BlockSpec((cout, 1), lambda i: (0, 0))],
        ),
        compiler_params=pltpu.CompilerParams(
            dimension_semantics=("arbitrary",),   # stat accumulators resident
            vmem_limit_bytes=vmem_limit),
    )(w2d, patches_t)


def _bn_apply_kernel(x_ref, s_ref, t_ref, o_ref):
    o_ref[...] = x_ref[...] * s_ref[...] + t_ref[...]


def bn_apply(x, scale, shift, *, tm, vmem_limit):
    cout, Mp = x.shape
    return pl.pallas_call(
        _bn_apply_kernel,
        out_shape=jax.ShapeDtypeStruct((cout, Mp), jnp.float32),
        grid_spec=pltpu.PrefetchScalarGridSpec(
            num_scalar_prefetch=0,
            grid=(Mp // tm,),
            in_specs=[pl.BlockSpec((cout, tm), lambda i: (0, i)),
                      pl.BlockSpec((cout, 1), lambda i: (0, 0)),
                      pl.BlockSpec((cout, 1), lambda i: (0, 0))],
            out_specs=pl.BlockSpec((cout, tm), lambda i: (0, i)),
        ),
        input_output_aliases={0: 0},    # normalize the conv slab in place
        compiler_params=pltpu.CompilerParams(
            dimension_semantics=("parallel",),
            vmem_limit_bytes=vmem_limit),
    )(x, scale, shift)


# -----------------------------------------------------------------------------
# Glue: transposed im2col (produces the lane-dense (K, M) patch matrix).
# -----------------------------------------------------------------------------
def im2col_t(x, kh, kw, stride, pad):
    """x: (N,C,H,W) -> (C*kh*kw, N*Ho*Wo); K ordered (C,kh,kw), M ordered (N,Ho,Wo)."""
    N, C, H, W = x.shape
    xp = jnp.pad(x, ((0, 0), (0, 0), (pad, pad), (pad, pad)))
    Ho = (H + 2 * pad - kh) // stride + 1
    Wo = (W + 2 * pad - kw) // stride + 1
    taps = []
    for i in range(kh):
        for j in range(kw):
            taps.append(xp[:, :, i:i + stride * Ho:stride,
                              j:j + stride * Wo:stride])   # (N, C, Ho, Wo)
    p = jnp.stack(taps, axis=0).reshape(kh, kw, N, C, Ho, Wo)
    p = jnp.transpose(p, (3, 0, 1, 2, 4, 5)).reshape(C * kh * kw, N * Ho * Wo)
    return p, Ho, Wo


@functools.partial(jax.jit, static_argnames=("stride", "kernel_size"))
def first_conv_forward(x, weight, gamma, beta, *, stride, kernel_size):
    """x: (N, Cin, H, W) NCHW.  weight: (Cout, Cin, kh, kw) (PyTorch OIHW)."""
    N, Cin, H, W = x.shape
    Cout = weight.shape[0]
    kh = kw = kernel_size
    pad = 1
    eps = 0.001  # nn.BatchNorm2d(eps=0.001)

    patches_t, Ho, Wo = im2col_t(x, kh, kw, stride, pad)     # (K, M)
    K, M = patches_t.shape
    w2d = weight.reshape(Cout, K).astype(jnp.float32)        # (Cout, K)
    g2d = gamma.reshape(Cout, 1).astype(jnp.float32)
    b2d = beta.reshape(Cout, 1).astype(jnp.float32)

    # Lane (M) tiling: tiles up to 8192 columns to amortize per-grid-step
    # overhead; tile count picked so padding stays < nt*128 zero columns
    # (excluded from mean/var by dividing by the true M).
    Mp0 = _round_up(M, 128)
    nt = -(-Mp0 // 8192)
    tm = _round_up(-(-Mp0 // nt), 128)
    Mp = nt * tm
    if Mp != M:
        patches_t = jnp.pad(patches_t, ((0, 0), (0, Mp - M)))

    # Chip-aware VMEM budgeting: ~80 MiB gate on 128-MiB v5e/v6e, ~40 MiB on
    # 64-MiB v7x; account for double buffering and sublane padding.
    vmem_cap = _vmem_capacity_bytes()
    vmem_limit = int(min(int(vmem_cap * 0.80), vmem_cap - 8 * 1024 * 1024))
    Kp = _round_up(K, 8)
    Cp = _round_up(Cout, 8)
    fused_bytes = (Cp * Mp * 4            # resident conv slab (scratch, 1x)
                   + 2 * Kp * tm * 4      # double-buffered patch tiles
                   + 2 * Cp * tm * 4      # double-buffered output tiles
                   + 2 * Cp * Kp * 4      # weights
                   + 8 * Cp * 128 * 4)    # per-channel scratch (padded)
    fused_budget = int(vmem_cap * 0.625)

    if fused_bytes <= fused_budget:
        out_cm = fused_conv_bn(patches_t, w2d, g2d, b2d, m_true=M, tm=tm,
                               eps=eps, vmem_limit=vmem_limit)     # (Cout, Mp)
    else:
        conv_cm, ch_sum, ch_sq = conv_matmul_stats(patches_t, w2d, tm=tm,
                                                   vmem_limit=vmem_limit)
        mean = ch_sum / M
        var = jnp.maximum(ch_sq / M - mean * mean, 0.0)
        scale = g2d * jax.lax.rsqrt(var + eps)
        shift = b2d - mean * scale
        out_cm = bn_apply(conv_cm, scale, shift, tm=tm,
                          vmem_limit=vmem_limit)                   # (Cout, Mp)

    # (Cout, M) -> NCHW; the channel-axis move is a leading-axis (cheap) swap.
    out = out_cm[:, :M].reshape(Cout, N, Ho, Wo).transpose(1, 0, 2, 3)
    return out


# -----------------------------------------------------------------------------
# main
# -----------------------------------------------------------------------------
if __name__ == "__main__":
    in_channels, out_channels = 4, 8
    strides, kernel_size = 2, 3
    N, H, W = 2, 16, 16

    key = jax.random.PRNGKey(0)
    kx, kw_ = jax.random.split(key)
    x = jax.random.normal(kx, (N, in_channels, H, W), dtype=jnp.float32)
    # deterministic synthetic conv weight (PyTorch OIHW); BN init gamma=1, beta=0
    weight = 0.1 * jax.random.normal(
        kw_, (out_channels, in_channels, kernel_size, kernel_size),
        dtype=jnp.float32)
    gamma = jnp.ones((out_channels,), jnp.float32)
    beta = jnp.zeros((out_channels,), jnp.float32)

    out = first_conv_forward(x, weight, gamma, beta,
                             stride=strides, kernel_size=kernel_size)
    out = jax.block_until_ready(out)

    # Reference: XLA conv + training-mode (batch-stat) BN.
    ref_conv = jax.lax.conv_general_dilated(
        x, weight, window_strides=(strides, strides),
        padding=((1, 1), (1, 1)),
        dimension_numbers=("NCHW", "OIHW", "NCHW"))
    m = ref_conv.mean(axis=(0, 2, 3), keepdims=True)
    v = ref_conv.var(axis=(0, 2, 3), keepdims=True)
    ref = (ref_conv - m) / jnp.sqrt(v + 0.001) * gamma[None, :, None, None] \
        + beta[None, :, None, None]

    assert out.shape == ref.shape, (out.shape, ref.shape)
    assert jnp.allclose(out, ref, atol=1e-4, rtol=1e-4), \
        float(jnp.max(jnp.abs(out - ref)))
    print("KERNEL_OK")
</pallas_src>

<mosaic_0001>
module attributes {stable_mosaic.version = 11 : i64} {
  func.func @_fused_conv_bn_kernel(%arg0: i32, %arg1: i32, %arg2: memref<8x36xf32, #tpu.memory_space<vmem>>, %arg3: memref<36x128xf32, #tpu.memory_space<vmem>>, %arg4: memref<8x1xf32, #tpu.memory_space<vmem>>, %arg5: memref<8x1xf32, #tpu.memory_space<vmem>>, %arg6: memref<8x128xf32, #tpu.memory_space<vmem>>, %arg7: memref<8x128xf32, #tpu.memory_space<vmem>>, %arg8: memref<8x1xf32, #tpu.memory_space<vmem>>, %arg9: memref<8x1xf32, #tpu.memory_space<vmem>>, %arg10: memref<8x1xf32, #tpu.memory_space<vmem>>, %arg11: memref<8x1xf32, #tpu.memory_space<vmem>>) attributes {dimension_semantics = [#tpu.dimension_semantics<arbitrary>, #tpu.dimension_semantics<arbitrary>], iteration_bounds = array<i64: 2, 1>, scalar_prefetch = 0 : i64, scratch_operands = 5 : i64, tpu.core_type = #tpu.core_type<tc>, window_params = [{pipeline_mode = #tpu.pipeline_mode<synchronous>, transform_indices = @transform_0, window_bounds = array<i64: 8, 36>}, {transform_indices = @transform_1, window_bounds = array<i64: 36, 128>}, {pipeline_mode = #tpu.pipeline_mode<synchronous>, transform_indices = @transform_2, window_bounds = array<i64: 8, 1>}, {pipeline_mode = #tpu.pipeline_mode<synchronous>, transform_indices = @transform_3, window_bounds = array<i64: 8, 1>}, {transform_indices = @transform_4, window_bounds = array<i64: 8, 128>}]} {
    %c128_i32 = arith.constant 128 : i32
    %0 = arith.muli %arg1, %c128_i32 : i32
    %1 = tpu.assume_multiple %0, 128 : i32
    %c0_i32 = arith.constant 0 : i32
    %2 = arith.cmpi eq, %arg0, %c0_i32 : i32
    %c0_i32_0 = arith.constant 0 : i32
    %3 = arith.cmpi eq, %arg1, %c0_i32_0 : i32
    %4 = arith.andi %2, %3 : i1
    %5 = arith.extui %4 : i1 to i32
    %c0_i32_1 = arith.constant 0 : i32
    %6 = arith.cmpi ne, %5, %c0_i32_1 : i32
    scf.if %6 {
      %cst = arith.constant 0.000000e+00 : f32
      %18 = vector.broadcast %cst : f32 to vector<8x1xf32>
      %c0 = arith.constant 0 : index
      %c0_8 = arith.constant 0 : index
      %19 = vector.load %arg8[%c0, %c0_8] : memref<8x1xf32, #tpu.memory_space<vmem>>, vector<8x1xf32>
      tpu.vector_store %arg8[%c0, %c0_8], %18 {strides = array<i32>} : memref<8x1xf32, #tpu.memory_space<vmem>>, vector<8x1xf32>,
      %cst_9 = arith.constant 0.000000e+00 : f32
      %20 = vector.broadcast %cst_9 : f32 to vector<8x1xf32>
      %c0_10 = arith.constant 0 : index
      %c0_11 = arith.constant 0 : index
      %21 = vector.load %arg9[%c0_10, %c0_11] : memref<8x1xf32, #tpu.memory_space<vmem>>, vector<8x1xf32>
      tpu.vector_store %arg9[%c0_10, %c0_11], %20 {strides = array<i32>} : memref<8x1xf32, #tpu.memory_space<vmem>>, vector<8x1xf32>,
    } else {
    }
    %c0_i32_2 = arith.constant 0 : i32
    %7 = arith.cmpi eq, %arg0, %c0_i32_2 : i32
    %8 = arith.extui %7 : i1 to i32
    %c0_i32_3 = arith.constant 0 : i32
    %9 = arith.cmpi ne, %8, %c0_i32_3 : i32
    scf.if %9 {
      %c0 = arith.constant 0 : index
      %c0_8 = arith.constant 0 : index
      %18 = vector.load %arg2[%c0, %c0_8] : memref<8x36xf32, #tpu.memory_space<vmem>>, vector<8x36xf32>
      %c0_9 = arith.constant 0 : index
      %c0_10 = arith.constant 0 : index
      %19 = vector.load %arg3[%c0_9, %c0_10] : memref<36x128xf32, #tpu.memory_space<vmem>>, vector<36x128xf32>
      %cst = arith.constant dense<0.000000e+00> : vector<8x128xf32>
      %20 = tpu.matmul %18, %19, %cst {dimension_numbers = #tpu.dot_dimension_numbers<[1], [0], [0], [1], [0, 0, 1, 1], [], []>} : vector<8x36xf32>, vector<36x128xf32>, vector<8x128xf32> -> vector<8x128xf32>
      %c0_11 = arith.constant 0 : index
      %c0_12 = arith.constant 0 : index
      %21 = vector.load %arg8[%c0_11, %c0_12] : memref<8x1xf32, #tpu.memory_space<vmem>>, vector<8x1xf32>
      %cst_13 = arith.constant dense<0.000000e+00> : vector<8xf32>
      %22 = vector.multi_reduction <add>, %20, %cst_13 [1] : vector<8x128xf32> to vector<8xf32>
      %23 = vector.shape_cast %22 : vector<8xf32> to vector<8x1xf32>
      %24 = arith.addf %21, %23 : vector<8x1xf32>
      %c0_14 = arith.constant 0 : index
      %c0_15 = arith.constant 0 : index
      %25 = vector.load %arg8[%c0_14, %c0_15] : memref<8x1xf32, #tpu.memory_space<vmem>>, vector<8x1xf32>
      tpu.vector_store %arg8[%c0_14, %c0_15], %24 {strides = array<i32>} : memref<8x1xf32, #tpu.memory_space<vmem>>, vector<8x1xf32>,
      %c0_16 = arith.constant 0 : index
      %c0_17 = arith.constant 0 : index
      %26 = vector.load %arg9[%c0_16, %c0_17] : memref<8x1xf32, #tpu.memory_space<vmem>>, vector<8x1xf32>
      %27 = arith.mulf %20, %20 : vector<8x128xf32>
      %cst_18 = arith.constant dense<0.000000e+00> : vector<8xf32>
      %28 = vector.multi_reduction <add>, %27, %cst_18 [1] : vector<8x128xf32> to vector<8xf32>
      %29 = vector.shape_cast %28 : vector<8xf32> to vector<8x1xf32>
      %30 = arith.addf %26, %29 : vector<8x1xf32>
      %c0_19 = arith.constant 0 : index
      %c0_20 = arith.constant 0 : index
      %31 = vector.load %arg9[%c0_19, %c0_20] : memref<8x1xf32, #tpu.memory_space<vmem>>, vector<8x1xf32>
      tpu.vector_store %arg9[%c0_19, %c0_20], %30 {strides = array<i32>} : memref<8x1xf32, #tpu.memory_space<vmem>>, vector<8x1xf32>,
      %c0_21 = arith.constant 0 : index
      %32 = arith.index_cast %1 : i32 to index
      %33 = vector.load %arg7[%c0_21, %32] : memref<8x128xf32, #tpu.memory_space<vmem>>, vector<8x128xf32>
      tpu.vector_store %arg7[%c0_21, %32], %20 {strides = array<i32>} : memref<8x128xf32, #tpu.memory_space<vmem>>, vector<8x128xf32>,
    } else {
    }
    %c1_i32 = arith.constant 1 : i32
    %10 = arith.cmpi eq, %arg0, %c1_i32 : i32
    %c0_i32_4 = arith.constant 0 : i32
    %11 = arith.cmpi eq, %arg1, %c0_i32_4 : i32
    %12 = arith.andi %10, %11 : i1
    %13 = arith.extui %12 : i1 to i32
    %c0_i32_5 = arith.constant 0 : i32
    %14 = arith.cmpi ne, %13, %c0_i32_5 : i32
    scf.if %14 {
      %c0 = arith.constant 0 : index
      %c0_8 = arith.constant 0 : index
      %18 = vector.load %arg8[%c0, %c0_8] : memref<8x1xf32, #tpu.memory_space<vmem>>, vector<8x1xf32>
      %cst = arith.constant 1.280000e+02 : f32
      %19 = vector.broadcast %cst : f32 to vector<8x1xf32>
      %20 = arith.divf %18, %19 : vector<8x1xf32>
      %c0_9 = arith.constant 0 : index
      %c0_10 = arith.constant 0 : index
      %21 = vector.load %arg9[%c0_9, %c0_10] : memref<8x1xf32, #tpu.memory_space<vmem>>, vector<8x1xf32>
      %cst_11 = arith.constant 1.280000e+02 : f32
      %22 = vector.broadcast %cst_11 : f32 to vector<8x1xf32>
      %23 = arith.divf %21, %22 : vector<8x1xf32>
      %24 = arith.mulf %20, %20 : vector<8x1xf32>
      %25 = arith.subf %23, %24 : vector<8x1xf32>
      %cst_12 = arith.constant 0.000000e+00 : f32
      %26 = vector.broadcast %cst_12 : f32 to vector<8x1xf32>
      %27 = arith.maximumf %25, %26 : vector<8x1xf32>
      %c0_13 = arith.constant 0 : index
      %c0_14 = arith.constant 0 : index
      %28 = vector.load %arg4[%c0_13, %c0_14] : memref<8x1xf32, #tpu.memory_space<vmem>>, vector<8x1xf32>
      %cst_15 = arith.constant 1.000000e-03 : f32
      %29 = vector.broadcast %cst_15 : f32 to vector<8x1xf32>
      %30 = arith.addf %27, %29 : vector<8x1xf32>
      %31 = math.rsqrt %30 : vector<8x1xf32>
      %32 = arith.mulf %28, %31 : vector<8x1xf32>
      %c0_16 = arith.constant 0 : index
      %c0_17 = arith.constant 0 : index
      %33 = vector.load %arg10[%c0_16, %c0_17] : memref<8x1xf32, #tpu.memory_space<vmem>>, vector<8x1xf32>
      tpu.vector_store %arg10[%c0_16, %c0_17], %32 {strides = array<i32>} : memref<8x1xf32, #tpu.memory_space<vmem>>, vector<8x1xf32>,
      %c0_18 = arith.constant 0 : index
      %c0_19 = arith.constant 0 : index
      %34 = vector.load %arg5[%c0_18, %c0_19] : memref<8x1xf32, #tpu.memory_space<vmem>>, vector<8x1xf32>
      %c0_20 = arith.constant 0 : index
      %c0_21 = arith.constant 0 : index
      %35 = vector.load %arg10[%c0_20, %c0_21] : memref<8x1xf32, #tpu.memory_space<vmem>>, vector<8x1xf32>
      %36 = arith.mulf %20, %35 : vector<8x1xf32>
      %37 = arith.subf %34, %36 : vector<8x1xf32>
      %c0_22 = arith.constant 0 : index
      %c0_23 = arith.constant 0 : index
      %38 = vector.load %arg11[%c0_22, %c0_23] : memref<8x1xf32, #tpu.memory_space<vmem>>, vector<8x1xf32>
      tpu.vector_store %arg11[%c0_22, %c0_23], %37 {strides = array<i32>} : memref<8x1xf32, #tpu.memory_space<vmem>>, vector<8x1xf32>,
    } else {
    }
    %c1_i32_6 = arith.constant 1 : i32
    %15 = arith.cmpi eq, %arg0, %c1_i32_6 : i32
    %16 = arith.extui %15 : i1 to i32
    %c0_i32_7 = arith.constant 0 : i32
    %17 = arith.cmpi ne, %16, %c0_i32_7 : i32
    scf.if %17 {
      %c0 = arith.constant 0 : index
      %18 = arith.index_cast %1 : i32 to index
      %19 = vector.load %arg7[%c0, %18] : memref<8x128xf32, #tpu.memory_space<vmem>>, vector<8x128xf32>
      %c0_8 = arith.constant 0 : index
      %c0_9 = arith.constant 0 : index
      %20 = vector.load %arg10[%c0_8, %c0_9] : memref<8x1xf32, #tpu.memory_space<vmem>>, vector<8x1xf32>
      %21 = vector.broadcast %20 : vector<8x1xf32> to vector<8x128xf32>
      %22 = arith.mulf %19, %21 : vector<8x128xf32>
      %c0_10 = arith.constant 0 : index
      %c0_11 = arith.constant 0 : index
      %23 = vector.load %arg11[%c0_10, %c0_11] : memref<8x1xf32, #tpu.memory_space<vmem>>, vector<8x1xf32>
      %24 = vector.broadcast %23 : vector<8x1xf32> to vector<8x128xf32>
      %25 = arith.addf %22, %24 : vector<8x128xf32>
      %c0_12 = arith.constant 0 : index
      %c0_13 = arith.constant 0 : index
      %26 = vector.load %arg6[%c0_12, %c0_13] : memref<8x128xf32, #tpu.memory_space<vmem>>, vector<8x128xf32>
      tpu.vector_store %arg6[%c0_12, %c0_13], %25 {strides = array<i32>} : memref<8x128xf32, #tpu.memory_space<vmem>>, vector<8x128xf32>,
    } else {
    }
    return
  }
  func.func @transform_0(%arg0: i32, %arg1: i32) -> (i32, i32) {
    %c0_i32 = arith.constant 0 : i32
    %c0_i32_0 = arith.constant 0 : i32
    %c0_i32_1 = arith.constant 0 : i32
    return %c0_i32, %c0_i32_0 : i32, i32
  }
  func.func @transform_1(%arg0: i32, %arg1: i32) -> (i32, i32) {
    %c1_i32 = arith.constant 1 : i32
    %0 = arith.subi %c1_i32, %arg0 : i32
    %1 = arith.muli %0, %arg1 : i32
    %c0_i32 = arith.constant 0 : i32
    %2 = arith.muli %arg0, %c0_i32 : i32
    %3 = arith.addi %1, %2 : i32
    %c0_i32_0 = arith.constant 0 : i32
    %c0_i32_1 = arith.constant 0 : i32
    return %c0_i32_0, %3 : i32, i32
  }
  func.func @transform_2(%arg0: i32, %arg1: i32) -> (i32, i32) {
    %c0_i32 = arith.constant 0 : i32
    %c0_i32_0 = arith.constant 0 : i32
    %c0_i32_1 = arith.constant 0 : i32
    return %c0_i32, %c0_i32_0 : i32, i32
  }
  func.func @transform_3(%arg0: i32, %arg1: i32) -> (i32, i32) {
    %c0_i32 = arith.constant 0 : i32
    %c0_i32_0 = arith.constant 0 : i32
    %c0_i32_1 = arith.constant 0 : i32
    return %c0_i32, %c0_i32_0 : i32, i32
  }
  func.func @transform_4(%arg0: i32, %arg1: i32) -> (i32, i32) {
    %0 = arith.muli %arg0, %arg1 : i32
    %c0_i32 = arith.constant 0 : i32
    %c0_i32_0 = arith.constant 0 : i32
    return %c0_i32, %0 : i32, i32
  }
}

</mosaic_0001>

<bundles_post_ra>
// kernel: first_conv_forward.1
= control target key start
LH: loop header
LB: loop body
LE: loop exit
PB: predicated region body
PF: predicated region fallthrough
CT: control target
= control target key end

     0   :  { %s571_s15 = smov 0   ;;  %s573_s16 = smov 0   ;;  %s631_s0 = inlined_call_operand.vmem [shape: f32[8,36], index: 0, kind: input, shape index: {}]   ;;  %s632_s1 = inlined_call_operand.vmem [shape: f32[36,128], index: 1, kind: input, shape index: {}]   ;;  %s633_s2 = inlined_call_operand.vmem [shape: f32[8,1], index: 2, kind: input, shape index: {}]   ;;  %s634_s3 = inlined_call_operand.vmem [shape: f32[8,1], index: 3, kind: input, shape index: {}]   ;;  %s635_s4 = inlined_call_operand.vmem [shape: f32[8,128], index: 4, kind: output, shape index: {}]  }
   0x1   :  { %s575_s17 = smov 0  }
   0x2 LB: > { %s26_s18 = sadd.s32 1, %s536_s16  ;;  %p455_p0 = scmp.ge.s32.totalorder %s540_s17, 1  ;;  %s540_s17 = sphi %s575_s17, %s14_s17   ;;  %s536_s16 = sphi %s573_s16, %s637_s16   ;;  %s532_s15 = sphi %s571_s15, %s636_s15  }
   0x3   : > { %p28_p1 = scmp.ge.s32.totalorder %s26_s18, 2  ;;  %p183_p2 = scmp.lt.s32.totalorder %s540_s17, 3 }
   0x5   : > { %s639_s18 = smov (%p28_p1, %s26_s18), 0  ;;  %p184_p3 = pnand %p455_p0, %p183_p2 }
   0x6   : > { %p225_p4 = scmp.eq.s32.totalorder (!%p184_p3), %s532_s15, 0 }
   0x7   : > { %187 = sbr.rel (%p184_p3) target bundleno = 557 (0x22d), region = 36 }
   0xc   : > { %230 = sbr.rel (!%p225_p4) target bundleno = 17 (0x11), region = 40  ;;  %vm231_vm0 = vcmask (%p225_p4), 7168   ;;  %v542_v0 = vmov (%p225_p4), 0.0  }
   0xd   : > { %232 = vst.msk [vmem:[#allocation3] sm:$0xff] (%p225_p4), %vm231_vm0, %v542_v0  ;;  %233 = vst.msk [vmem:[#allocation4] sm:$0xff] (%p225_p4), %vm231_vm0, %v542_v0 }
  0x11 PF: > { %p457_p5 = scmp.ne.s32.totalorder %s532_s15, 0 }
  0x13   : > { %236 = sbr.rel (%p457_p5) target bundleno = 373 (0x175), region = 44 }
  0x18   : > { %v242_v1 = vld [vmem:[%s632_s1 + $0x20] sm:$0xf]  ;;  %vm247_vm1 = vcmask 1043456   ;;  %v543_v2 = vmov 0.0   ;;  %v241_v3 = vld [vmem:[%s632_s1 + $0x18] sm:$0xff]  ;;  %vm544_vm2 = vmmov 0  }
  0x19   : > { %474 = vmatprep.subr.mxu0 %v543_v2  ;;  %484 = vmatprep.mubr.msk.f32.mxu0 %vm544_vm2, %v543_v2  ;;  %v240_v4 = vld [vmem:[%s632_s1 + $0x10] sm:$0xff]  ;;  %v239_v5 = vld [vmem:[%s632_s1 + $0x8] sm:$0xff]  ;;  %v238_v6 = vld [vmem:[%s632_s1] sm:$0xff]  ;;  %vm243_vm3 = vcmask 293888   ;;  %vm325_vm4 = vcmask 7168  }
  0x1a   : > { %475 = vmatpush3.msk.msra.mxu0 %vm247_vm1, %v242_v1  ;;  %v237_v7 = vld [vmem:[%s631_s0] sm:$0xff]  ;;  %v321_v11 = vld [vmem:[#allocation3] sm:$0xff]  ;;  %v327_v14 = vld [vmem:[#allocation4] sm:$0xff] }
  0x1b   : > { %476 = vmatprep.subr.mxu0 %v543_v2 }
  0x1c   : > { %477 = vmatpush3.msra.mxu0 %v241_v3 }
  0x1d   : > { %478 = vmatprep.subr.mxu0 %v543_v2 }
  0x1e   : > { %479 = vmatpush3.msra.mxu0 %v240_v4 }
  0x1f   : > { %480 = vmatprep.subr.mxu0 %v543_v2 }
  0x20   : > { %481 = vmatpush3.msra.mxu0 %v239_v5 }
  0x21   : > { %482 = vmatprep.subr.mxu0 %v543_v2 }
  0x22   : > { %483 = vmatpush3.msra.mxu0 %v238_v6 }
  0x23   : > { %485 = vmatmul.mubr.msk.f32.vlgmr.msra.gmra.mxu0 %vm243_vm3, %v237_v7 }
  0xe3   : > { %v317_v8 = vpop.f32.mrf.mxu0 }
  0xe4   : > { %336 = vst [vmem:[#allocation2] sm:$0xff] %v317_v8  ;;  %322 = vadd.xlane.f32.xlu0 %v317_v8  ;;  %v328_v10 = vmul.f32 %v317_v8, %v317_v8 }
  0xe5   : > { %v486_v9 = vpop.f32.mrf.mxu0 }
  0xe8   : > { %329 = vadd.xlane.f32.xlu0 %v328_v10 }
 0x16d   : > { %v323_v12 = vpop.xlane.xlu0 %322 }
 0x16e   : > { %v324_v13 = vadd.f32 %v323_v12, %v321_v11 }
 0x170   : > { %326 = vst.msk [vmem:[#allocation3] sm:$0xff] %vm325_vm4, %v324_v13 }
 0x171   : > { %v330_v15 = vpop.xlane.xlu0 %329 }
 0x172   : > { %v331_v16 = vadd.f32 %v330_v15, %v327_v14 }
 0x174   : > { %332 = vst.msk [vmem:[#allocation4] sm:$0xff] %vm325_vm4, %v331_v16 }
 0x175 PF: > { %p337_p6 = scmp.eq.s32.totalorder %s532_s15, 1 }
 0x176   : > { %v350_v25 = vld [vmem:[%s633_s2] sm:$0xff] (%p337_p6)  ;;  %vm354_vm5 = vcmask (%p337_p6), 7168  }
 0x177   : > { %341 = sbr.rel (!%p337_p6) target bundleno = 417 (0x1a1), region = 48  ;;  %v342_v17 = vld [vmem:[#allocation3] sm:$0xff] (%p337_p6)  ;;  %v356_v28 = vld [vmem:[%s634_s3] sm:$0xff] (%p337_p6) }
 0x178   : > { %v344_v19 = vmul.f32 (%p337_p6), 0.0078125, %v342_v17 }
 0x17a   : > { %v347_v21 = vmul.f32 (%p337_p6), %v344_v19, %v344_v19 }
 0x17b   : > { %v345_v18 = vld [vmem:[#allocation4] sm:$0xff] (%p337_p6) }
 0x17c   : > { %v346_v20 = vmul.f32 0.0078125, %v345_v18 }
 0x17e   : > { %v348_v22 = vsub.f32 %v346_v20, %v347_v21 }
 0x180   : > { %v349_v23 = vmax.f32 %v348_v22, 0.0 }
 0x182   : > { %v351_v24 = vadd.f32 0.001, %v349_v23 }
 0x184   : > { %515 = vrsqrt.f32 %v351_v24 }
 0x191   : > { %v516_v26 = vpop.eup %515 }
 0x192   : > { %v353_v27 = vmul.f32 %v516_v26, %v350_v25 }
 0x194   : > { %355 = vst.msk [vmem:[#allocation5] sm:$0xff] %vm354_vm5, %v353_v27 }
 0x19b   : > { %v357_v29 = vld [vmem:[#allocation5] sm:$0xff] }
 0x19c   : > { %v358_v30 = vmul.f32 %v357_v29, %v344_v19 }
 0x19e   : > { %v359_v31 = vsub.f32 %v356_v28, %v358_v30 }
 0x1a0   : > { %360 = vst.msk [vmem:[#allocation6] sm:$0xff] %vm354_vm5, %v359_v31 }
 0x1a1 PF: > { %p461_p7 = scmp.ne.s32.totalorder %s532_s15, 1 }
 0x1a3   : > { %363 = sbr.rel (%p461_p7) target bundleno = 557 (0x22d), region = 52 }
 0x1a8   : > { %v368_v32 = vld [vmem:[#allocation5] sm:$0xff]  ;;  %v545_v33 = vmov 0   ;;  %v375_v34 = vld [vmem:[#allocation6] sm:$0xff] }
 0x1a9   : > { %517 = vset.pattern.permute.xlu0 %v545_v33  ;;  %v367_v36 = vld [vmem:[#allocation2] sm:$0xff] }
 0x1aa   : > { %371 = vperm.xlu0 %517, %v368_v32  }
 0x1ae   : > { %378 = vperm.xlu0 %517, %v375_v34  }
 0x225   : > { %v372_v35 = vpop.permute.xlu0 %371 }
 0x226   : > { %v374_v37 = vmul.f32 %v372_v35, %v367_v36 }
 0x229   : > { %v379_v38 = vpop.permute.xlu0 %378 }
 0x22a   : > { %v381_v39 = vadd.f32 %v379_v38, %v374_v37 }
 0x22c   : > { %382 = vst [vmem:[%s635_s4] sm:$0xff] %v381_v39 }
 0x22d PF: > { %s14_s17 = sadd.s32 1, %s540_s17   ;;  %s636_s15 = smov %s536_s16 }
 0x22e   : > { %p11_p8 = scmp.ge.s32.totalorder %s14_s17, 4   ;;  %s637_s16 = smov %s639_s18 }
 0x230   :  { %13 = sbr.rel (!%p11_p8) target bundleno = 2 (0x2), region = 84 }

</bundles_post_ra>
